<compile_context>
chip_gen: v5e
topology: v5e:2x2
jax: 0.10.0
libtpu: 0.0.40
codegen_flags: <defaults>
</compile_context>

<pallas_src>
import functools

import jax
import jax.numpy as jnp
from jax.experimental import pallas as pl
from jax.experimental.pallas import tpu as pltpu


def _conv_bn_relu_kernel(x0_ref, x1_ref, x2_ref, w_ref, bias_ref, o_ref,
                         acc_ref):
    """One (batch, row-tile, cout-tile) block of 3x3 conv + folded BN + ReLU.

    x{k}_ref: (1, TH, Wp, Cin)  bf16 row-shifted (ky=k) padded input slab
    w_ref:    (3, 3*Cin, CT)    bf16 BN-scale-folded weights (rows kx-major)
    bias_ref: (1, CT)           f32 folded conv-bias + BN shift
    o_ref:    (1, TH, Wo, CT)   output block
    acc_ref:  (TH*Wo, CT)       f32 VMEM scratch accumulator
    """
    _, th, wo, ct = o_ref.shape
    cin = x0_ref.shape[-1]

    x_refs = (x0_ref, x1_ref, x2_ref)
    for ky in range(3):                                   # unrolled at trace
        slab = x_refs[ky][0]                              # (TH, Wp, Cin)
        # Width-im2col for this row tap: kx-major along the lane axis.
        patches = jnp.concatenate(
            [slab[:, kx:kx + wo, :] for kx in range(3)], axis=-1)
        contrib = jnp.dot(patches.reshape(th * wo, 3 * cin), w_ref[ky],
                          preferred_element_type=jnp.float32)
        if ky == 0:
            acc_ref[...] = contrib
        else:
            acc_ref[...] += contrib

    y = jnp.maximum(acc_ref[...] + bias_ref[...], 0.0)    # BN shift + ReLU
    o_ref[...] = y.reshape(1, th, wo, ct).astype(o_ref.dtype)


@functools.partial(jax.jit,
                   static_argnames=("padding", "row_tile", "cout_tile"))
def block_forward(x_nchw, conv_w, conv_b, bn_gamma, bn_beta, bn_mean, bn_var,
                  *, padding=1, eps=1e-5, row_tile=16, cout_tile=128):
    """Block.forward (eval-mode BN).  x_nchw: (N, Cin, H, W) -> NCHW output."""
    N, Cin, H, W = x_nchw.shape
    Cout = conv_w.shape[0]
    Ho, Wo = H + 2 * padding - 2, W + 2 * padding - 2     # k=3, stride=1
    Wp = W + 2 * padding

    # ---- glue (plain JAX): layout, halo views, parameter folding ---------
    x_nhwc = jnp.transpose(x_nchw, (0, 2, 3, 1)).astype(jnp.bfloat16)
    x_pad = jnp.pad(x_nhwc,
                    ((0, 0), (padding, padding), (padding, padding), (0, 0)))
    # Three row-shifted views bake the vertical halo into non-overlapping
    # BlockSpec row tiles (each view: (N, Ho, Wp, Cin)).
    x_views = [x_pad[:, ky:ky + Ho, :, :] for ky in range(3)]

    scale = (bn_gamma / jnp.sqrt(bn_var + eps)).astype(jnp.float32)   # (Cout,)
    bias2d = (scale * (conv_b - bn_mean) + bn_beta).astype(
        jnp.float32).reshape(1, Cout)

    # torch (Cout, Cin, kH, kW) -> (kH, kW, Cin, Cout); fold BN scale into the
    # weights; group kx taps: (3, 3*Cin, Cout), rows kx-major / cin-minor.
    w = jnp.transpose(conv_w, (2, 3, 1, 0)) * scale[None, None, None, :]
    w = w.reshape(3, 3 * Cin, Cout).astype(jnp.bfloat16)

    th = min(row_tile, Ho)
    ct = min(cout_tile, Cout)
    grid = (N, pl.cdiv(Ho, th), pl.cdiv(Cout, ct))

    x_spec = pl.BlockSpec((1, th, Wp, Cin), lambda n, i, co: (n, i, 0, 0))
    w_spec = pl.BlockSpec((3, 3 * Cin, ct), lambda n, i, co: (0, 0, co))
    b_spec = pl.BlockSpec((1, ct), lambda n, i, co: (0, co))
    o_spec = pl.BlockSpec((1, th, Wo, ct), lambda n, i, co: (n, i, 0, co))

    out_nhwc = pl.pallas_call(
        _conv_bn_relu_kernel,
        out_shape=jax.ShapeDtypeStruct((N, Ho, Wo, Cout), x_nchw.dtype),
        grid_spec=pltpu.PrefetchScalarGridSpec(
            num_scalar_prefetch=0,
            grid=grid,
            in_specs=[x_spec, x_spec, x_spec, w_spec, b_spec],
            out_specs=o_spec,
            scratch_shapes=[pltpu.VMEM((th * Wo, ct), jnp.float32)]),
        compiler_params=pltpu.CompilerParams(
            dimension_semantics=("parallel", "parallel", "parallel"),
            vmem_limit_bytes=64 * 1024 * 1024),
    )(x_views[0], x_views[1], x_views[2], w, bias2d)

    return jnp.transpose(out_nhwc, (0, 3, 1, 2))                      # NCHW


def _reference(x_nchw, conv_w, conv_b, bn_gamma, bn_beta, bn_mean, bn_var,
               *, padding=1, eps=1e-5):
    """Pure-JAX f32 reference (lax conv) for correctness checking."""
    y = jax.lax.conv_general_dilated(
        x_nchw, conv_w, window_strides=(1, 1),
        padding=[(padding, padding), (padding, padding)],
        dimension_numbers=("NCHW", "OIHW", "NCHW"))
    y = y + conv_b[None, :, None, None]
    scale = bn_gamma / jnp.sqrt(bn_var + eps)
    y = scale[None, :, None, None] * (y - bn_mean[None, :, None, None]) \
        + bn_beta[None, :, None, None]
    return jnp.maximum(y, 0.0)


if __name__ == "__main__":
    # Small shapes consistent with the module: Block(in_channels=4,
    # out_channels=8, padding=1); batch=2, spatial=16.
    N, Cin, Cout, H, W, P = 2, 4, 8, 16, 16, 1

    key = jax.random.PRNGKey(0)
    k_x, k_w, k_b, k_g, k_be, k_m, k_v = jax.random.split(key, 7)

    x = jax.random.normal(k_x, (N, Cin, H, W), jnp.float32)
    conv_w = jax.random.normal(k_w, (Cout, Cin, 3, 3), jnp.float32) * 0.1
    conv_b = jax.random.normal(k_b, (Cout,), jnp.float32) * 0.1
    bn_gamma = 1.0 + 0.1 * jax.random.normal(k_g, (Cout,), jnp.float32)
    bn_beta = 0.1 * jax.random.normal(k_be, (Cout,), jnp.float32)
    bn_mean = 0.1 * jax.random.normal(k_m, (Cout,), jnp.float32)
    bn_var = jax.random.uniform(k_v, (Cout,), jnp.float32, 0.5, 1.5)

    out = block_forward(x, conv_w, conv_b, bn_gamma, bn_beta,
                        bn_mean, bn_var, padding=P, row_tile=8)
    out = jax.block_until_ready(out)

    ref = _reference(x, conv_w, conv_b, bn_gamma, bn_beta, bn_mean, bn_var,
                     padding=P)
    assert out.shape == (N, Cout, H, W), out.shape
    # Loose tolerance accounts for the bf16 MXU inputs (f32 accumulation).
    assert jnp.allclose(out, ref, atol=5e-2, rtol=5e-2), \
        float(jnp.max(jnp.abs(out - ref)))

    print("KERNEL_OK")
</pallas_src>

<mosaic_0001>
module attributes {stable_mosaic.version = 11 : i64} {
  func.func @_conv_bn_relu_kernel(%arg0: i32, %arg1: i32, %arg2: i32, %arg3: memref<1x8x18x4xbf16, #tpu.memory_space<vmem>>, %arg4: memref<1x8x18x4xbf16, #tpu.memory_space<vmem>>, %arg5: memref<1x8x18x4xbf16, #tpu.memory_space<vmem>>, %arg6: memref<3x12x8xbf16, #tpu.memory_space<vmem>>, %arg7: memref<1x8xf32, #tpu.memory_space<vmem>>, %arg8: memref<1x8x16x8xf32, #tpu.memory_space<vmem>>, %arg9: memref<128x8xf32, #tpu.memory_space<vmem>>) attributes {dimension_semantics = [#tpu.dimension_semantics<parallel>, #tpu.dimension_semantics<parallel>, #tpu.dimension_semantics<parallel>], iteration_bounds = array<i64: 2, 2, 1>, scalar_prefetch = 0 : i64, scratch_operands = 1 : i64, tpu.core_type = #tpu.core_type<tc>, window_params = [{transform_indices = @transform_0, window_bounds = array<i64: 1, 8, 18, 4>}, {transform_indices = @transform_1, window_bounds = array<i64: 1, 8, 18, 4>}, {transform_indices = @transform_2, window_bounds = array<i64: 1, 8, 18, 4>}, {transform_indices = @transform_3, window_bounds = array<i64: 3, 12, 8>}, {transform_indices = @transform_4, window_bounds = array<i64: 1, 8>}, {transform_indices = @transform_5, window_bounds = array<i64: 1, 8, 16, 8>}]} {
    %c0 = arith.constant 0 : index
    %c0_0 = arith.constant 0 : index
    %c0_1 = arith.constant 0 : index
    %c0_2 = arith.constant 0 : index
    %0 = vector.load %arg3[%c0, %c0_0, %c0_1, %c0_2] : memref<1x8x18x4xbf16, #tpu.memory_space<vmem>>, vector<1x8x18x4xbf16>
    %1 = vector.shape_cast %0 : vector<1x8x18x4xbf16> to vector<8x18x4xbf16>
    %2 = vector.extract_strided_slice %1 {offsets = [0, 0, 0], sizes = [8, 16, 4], strides = [1, 1, 1]} : vector<8x18x4xbf16> to vector<8x16x4xbf16>
    %3 = vector.extract_strided_slice %1 {offsets = [0, 1, 0], sizes = [8, 16, 4], strides = [1, 1, 1]} : vector<8x18x4xbf16> to vector<8x16x4xbf16>
    %4 = vector.extract_strided_slice %1 {offsets = [0, 2, 0], sizes = [8, 16, 4], strides = [1, 1, 1]} : vector<8x18x4xbf16> to vector<8x16x4xbf16>
    %5 = tpu.concatenate %2, %3, %4 in 2 : vector<8x16x4xbf16>, vector<8x16x4xbf16>, vector<8x16x4xbf16> -> vector<8x16x12xbf16>
    %6 = vector.shape_cast %5 : vector<8x16x12xbf16> to vector<128x12xbf16>
    %c0_3 = arith.constant 0 : index
    %c0_4 = arith.constant 0 : index
    %c0_5 = arith.constant 0 : index
    %7 = vector.load %arg6[%c0_3, %c0_4, %c0_5] : memref<3x12x8xbf16, #tpu.memory_space<vmem>>, vector<1x12x8xbf16>
    %8 = vector.shape_cast %7 : vector<1x12x8xbf16> to vector<12x8xbf16>
    %cst = arith.constant dense<0.000000e+00> : vector<128x8xf32>
    %9 = tpu.matmul %6, %8, %cst {dimension_numbers = #tpu.dot_dimension_numbers<[1], [0], [0], [1], [0, 0, 1, 1], [], []>} : vector<128x12xbf16>, vector<12x8xbf16>, vector<128x8xf32> -> vector<128x8xf32>
    %c0_6 = arith.constant 0 : index
    %c0_7 = arith.constant 0 : index
    %10 = vector.load %arg9[%c0_6, %c0_7] : memref<128x8xf32, #tpu.memory_space<vmem>>, vector<128x8xf32>
    tpu.vector_store %arg9[%c0_6, %c0_7], %9 {strides = array<i32>} : memref<128x8xf32, #tpu.memory_space<vmem>>, vector<128x8xf32>,
    %c0_8 = arith.constant 0 : index
    %c0_9 = arith.constant 0 : index
    %c0_10 = arith.constant 0 : index
    %c0_11 = arith.constant 0 : index
    %11 = vector.load %arg4[%c0_8, %c0_9, %c0_10, %c0_11] : memref<1x8x18x4xbf16, #tpu.memory_space<vmem>>, vector<1x8x18x4xbf16>
    %12 = vector.shape_cast %11 : vector<1x8x18x4xbf16> to vector<8x18x4xbf16>
    %13 = vector.extract_strided_slice %12 {offsets = [0, 0, 0], sizes = [8, 16, 4], strides = [1, 1, 1]} : vector<8x18x4xbf16> to vector<8x16x4xbf16>
    %14 = vector.extract_strided_slice %12 {offsets = [0, 1, 0], sizes = [8, 16, 4], strides = [1, 1, 1]} : vector<8x18x4xbf16> to vector<8x16x4xbf16>
    %15 = vector.extract_strided_slice %12 {offsets = [0, 2, 0], sizes = [8, 16, 4], strides = [1, 1, 1]} : vector<8x18x4xbf16> to vector<8x16x4xbf16>
    %16 = tpu.concatenate %13, %14, %15 in 2 : vector<8x16x4xbf16>, vector<8x16x4xbf16>, vector<8x16x4xbf16> -> vector<8x16x12xbf16>
    %17 = vector.shape_cast %16 : vector<8x16x12xbf16> to vector<128x12xbf16>
    %c1 = arith.constant 1 : index
    %c0_12 = arith.constant 0 : index
    %c0_13 = arith.constant 0 : index
    %18 = vector.load %arg6[%c1, %c0_12, %c0_13] : memref<3x12x8xbf16, #tpu.memory_space<vmem>>, vector<1x12x8xbf16>
    %19 = vector.shape_cast %18 : vector<1x12x8xbf16> to vector<12x8xbf16>
    %cst_14 = arith.constant dense<0.000000e+00> : vector<128x8xf32>
    %20 = tpu.matmul %17, %19, %cst_14 {dimension_numbers = #tpu.dot_dimension_numbers<[1], [0], [0], [1], [0, 0, 1, 1], [], []>} : vector<128x12xbf16>, vector<12x8xbf16>, vector<128x8xf32> -> vector<128x8xf32>
    %c0_15 = arith.constant 0 : index
    %c0_16 = arith.constant 0 : index
    %21 = vector.load %arg9[%c0_15, %c0_16] : memref<128x8xf32, #tpu.memory_space<vmem>>, vector<128x8xf32>
    %22 = arith.addf %21, %20 : vector<128x8xf32>
    %c0_17 = arith.constant 0 : index
    %c0_18 = arith.constant 0 : index
    %23 = vector.load %arg9[%c0_17, %c0_18] : memref<128x8xf32, #tpu.memory_space<vmem>>, vector<128x8xf32>
    tpu.vector_store %arg9[%c0_17, %c0_18], %22 {strides = array<i32>} : memref<128x8xf32, #tpu.memory_space<vmem>>, vector<128x8xf32>,
    %c0_19 = arith.constant 0 : index
    %c0_20 = arith.constant 0 : index
    %c0_21 = arith.constant 0 : index
    %c0_22 = arith.constant 0 : index
    %24 = vector.load %arg5[%c0_19, %c0_20, %c0_21, %c0_22] : memref<1x8x18x4xbf16, #tpu.memory_space<vmem>>, vector<1x8x18x4xbf16>
    %25 = vector.shape_cast %24 : vector<1x8x18x4xbf16> to vector<8x18x4xbf16>
    %26 = vector.extract_strided_slice %25 {offsets = [0, 0, 0], sizes = [8, 16, 4], strides = [1, 1, 1]} : vector<8x18x4xbf16> to vector<8x16x4xbf16>
    %27 = vector.extract_strided_slice %25 {offsets = [0, 1, 0], sizes = [8, 16, 4], strides = [1, 1, 1]} : vector<8x18x4xbf16> to vector<8x16x4xbf16>
    %28 = vector.extract_strided_slice %25 {offsets = [0, 2, 0], sizes = [8, 16, 4], strides = [1, 1, 1]} : vector<8x18x4xbf16> to vector<8x16x4xbf16>
    %29 = tpu.concatenate %26, %27, %28 in 2 : vector<8x16x4xbf16>, vector<8x16x4xbf16>, vector<8x16x4xbf16> -> vector<8x16x12xbf16>
    %30 = vector.shape_cast %29 : vector<8x16x12xbf16> to vector<128x12xbf16>
    %c2 = arith.constant 2 : index
    %c0_23 = arith.constant 0 : index
    %c0_24 = arith.constant 0 : index
    %31 = vector.load %arg6[%c2, %c0_23, %c0_24] : memref<3x12x8xbf16, #tpu.memory_space<vmem>>, vector<1x12x8xbf16>
    %32 = vector.shape_cast %31 : vector<1x12x8xbf16> to vector<12x8xbf16>
    %cst_25 = arith.constant dense<0.000000e+00> : vector<128x8xf32>
    %33 = tpu.matmul %30, %32, %cst_25 {dimension_numbers = #tpu.dot_dimension_numbers<[1], [0], [0], [1], [0, 0, 1, 1], [], []>} : vector<128x12xbf16>, vector<12x8xbf16>, vector<128x8xf32> -> vector<128x8xf32>
    %c0_26 = arith.constant 0 : index
    %c0_27 = arith.constant 0 : index
    %34 = vector.load %arg9[%c0_26, %c0_27] : memref<128x8xf32, #tpu.memory_space<vmem>>, vector<128x8xf32>
    %35 = arith.addf %34, %33 : vector<128x8xf32>
    %c0_28 = arith.constant 0 : index
    %c0_29 = arith.constant 0 : index
    %36 = vector.load %arg9[%c0_28, %c0_29] : memref<128x8xf32, #tpu.memory_space<vmem>>, vector<128x8xf32>
    tpu.vector_store %arg9[%c0_28, %c0_29], %35 {strides = array<i32>} : memref<128x8xf32, #tpu.memory_space<vmem>>, vector<128x8xf32>,
    %c0_30 = arith.constant 0 : index
    %c0_31 = arith.constant 0 : index
    %37 = vector.load %arg9[%c0_30, %c0_31] : memref<128x8xf32, #tpu.memory_space<vmem>>, vector<128x8xf32>
    %c0_32 = arith.constant 0 : index
    %c0_33 = arith.constant 0 : index
    %38 = vector.load %arg7[%c0_32, %c0_33] : memref<1x8xf32, #tpu.memory_space<vmem>>, vector<1x8xf32>
    %39 = vector.broadcast %38 : vector<1x8xf32> to vector<128x8xf32>
    %40 = arith.addf %37, %39 : vector<128x8xf32>
    %cst_34 = arith.constant 0.000000e+00 : f32
    %41 = vector.broadcast %cst_34 : f32 to vector<128x8xf32>
    %42 = arith.maximumf %40, %41 : vector<128x8xf32>
    %43 = vector.shape_cast %42 : vector<128x8xf32> to vector<1x8x16x8xf32>
    %c0_35 = arith.constant 0 : index
    %c0_36 = arith.constant 0 : index
    %c0_37 = arith.constant 0 : index
    %c0_38 = arith.constant 0 : index
    %44 = vector.load %arg8[%c0_35, %c0_36, %c0_37, %c0_38] : memref<1x8x16x8xf32, #tpu.memory_space<vmem>>, vector<1x8x16x8xf32>
    tpu.vector_store %arg8[%c0_35, %c0_36, %c0_37, %c0_38], %43 {strides = array<i32>} : memref<1x8x16x8xf32, #tpu.memory_space<vmem>>, vector<1x8x16x8xf32>,
    return
  }
  func.func @transform_0(%arg0: i32, %arg1: i32, %arg2: i32) -> (i32, i32, i32, i32) {
    %c0_i32 = arith.constant 0 : i32
    %c0_i32_0 = arith.constant 0 : i32
    %c0_i32_1 = arith.constant 0 : i32
    return %arg0, %arg1, %c0_i32, %c0_i32_0 : i32, i32, i32, i32
  }
  func.func @transform_1(%arg0: i32, %arg1: i32, %arg2: i32) -> (i32, i32, i32, i32) {
    %c0_i32 = arith.constant 0 : i32
    %c0_i32_0 = arith.constant 0 : i32
    %c0_i32_1 = arith.constant 0 : i32
    return %arg0, %arg1, %c0_i32, %c0_i32_0 : i32, i32, i32, i32
  }
  func.func @transform_2(%arg0: i32, %arg1: i32, %arg2: i32) -> (i32, i32, i32, i32) {
    %c0_i32 = arith.constant 0 : i32
    %c0_i32_0 = arith.constant 0 : i32
    %c0_i32_1 = arith.constant 0 : i32
    return %arg0, %arg1, %c0_i32, %c0_i32_0 : i32, i32, i32, i32
  }
  func.func @transform_3(%arg0: i32, %arg1: i32, %arg2: i32) -> (i32, i32, i32) {
    %c0_i32 = arith.constant 0 : i32
    %c0_i32_0 = arith.constant 0 : i32
    %c0_i32_1 = arith.constant 0 : i32
    return %c0_i32, %c0_i32_0, %arg2 : i32, i32, i32
  }
  func.func @transform_4(%arg0: i32, %arg1: i32, %arg2: i32) -> (i32, i32) {
    %c0_i32 = arith.constant 0 : i32
    %c0_i32_0 = arith.constant 0 : i32
    return %c0_i32, %arg2 : i32, i32
  }
  func.func @transform_5(%arg0: i32, %arg1: i32, %arg2: i32) -> (i32, i32, i32, i32) {
    %c0_i32 = arith.constant 0 : i32
    %c0_i32_0 = arith.constant 0 : i32
    return %arg0, %arg1, %c0_i32, %arg2 : i32, i32, i32, i32
  }
}

</mosaic_0001>

<bundles_post_ra>
// kernel: block_forward.1
= control target key start
LH: loop header
LB: loop body
LE: loop exit
PB: predicated region body
PF: predicated region fallthrough
CT: control target
= control target key end

     0   :  { %s2106_s18 = smov 0   ;;  %s2108_s19 = smov 0   ;;  %s2692_s0 = inlined_call_operand.vmem [shape: bf16[2,16,18,4], index: 0, kind: input, shape index: {}]   ;;  %s2693_s1 = inlined_call_operand.vmem [shape: bf16[2,16,18,4], index: 1, kind: input, shape index: {}]   ;;  %s2694_s2 = inlined_call_operand.vmem [shape: bf16[2,16,18,4], index: 2, kind: input, shape index: {}]   ;;  %s2695_s3 = inlined_call_operand.vmem [shape: bf16[3,12,8], index: 3, kind: input, shape index: {}]   ;;  %s2696_s4 = inlined_call_operand.vmem [shape: f32[1,8], index: 4, kind: input, shape index: {}]   ;;  %s2697_s5 = inlined_call_operand.vmem [shape: f32[2,16,16,8], index: 5, kind: output, shape index: {}]  }
   0x1   :  { %s2110_s20 = smov 0   ;;  %s2112_s21 = smov 0  }
   0x2   :  { %s2114_s22 = smov 0  }
   0x3 LB: > { %s30_s23 = sadd.s32 1, %s2064_s20  ;;  %s34_s24 = sadd.s32 1, %s2068_s21  ;;  %s2072_s22 = sphi %s2114_s22, %s15_s22   ;;  %s2068_s21 = sphi %s2112_s21, %s2701_s21   ;;  %s2064_s20 = sphi %s2110_s20, %s2700_s20   ;;  %s2060_s19 = sphi %s2108_s19, %s2699_s19   ;;  %s2056_s18 = sphi %s2106_s18, %s2698_s18  }
   0x4   : > { %p32_p0 = scmp.ge.s32.totalorder %s30_s23, 2  ;;  %p1810_p1 = scmp.ge.s32.totalorder %s2072_s22, 1 }
   0x5   : > { %p271_p2 = scmp.lt.s32.totalorder %s2072_s22, 5 }
   0x6   : > { %s2703_s23 = smov (%p32_p0, %s30_s23), 0  ;;  %s2705_s24 = smov (!%p32_p0, %s34_s24), %s2068_s21 }
   0x7   : > { %p272_p3 = pnand %p1810_p1, %p271_p2  ;;  %p36_p4 = scmp.ge.s32.totalorder %s2705_s24, 2 }
   0x8   : > { %s1811_s25 = sshll.u32 (!%p272_p3), %s2056_s18, 3  ;;  %p340_p5 = scmp.lt.s32.totalorder (!%p272_p3), %s2060_s19, 1 }
   0x9   : > { %s2707_s24 = smov (%p36_p4, %s2705_s24), 0  ;;  %275 = sbr.rel (%p272_p3) target bundleno = 422 (0x1a6), region = 40 }
   0xa   : > { %p342_p6 = scmp.lt.s32.totalorder (!%p272_p3), %s1811_s25, 15  ;;  %s2074_s14 = smov (!%p272_p3), 8  }
   0xb   : > { %s2075_s15 = smov (!%p272_p3), 4  }
   0xe   : > { %s2709_s19 = smov (!%p340_p5, %s2060_s19), 1  ;;  %s2711_s25 = smov (!%p342_p6, %s1811_s25), 15  ;;  %vm595_vm0 = vcmask 1046528   ;;  %vm482_vm1 = vsmask.f32 7424  ;;  %vm694_vm2 = vcmask 1045504  }
   0xf   : > { %s1990_s26 = smul.u32 48, %s2709_s19  ;;  %vm636_vm3 = vcmask 31744   ;;  %vm653_vm4 = vcmask 64512   ;;  %vm677_vm5 = vcmask 97280   ;;  %s1819_s11 = sshll.u32 %s2709_s19, 5 }
  0x10   : > { %s1989_s27 = smul.u32 3, %s2711_s25 }
  0x12   : > { %s346_s28 = sadd.s32 %s1990_s26, %s1989_s27 }
  0x13   : > { %s1812_s29 = sshll.u32 %s346_s28, 2 }
  0x14   : > { %s2145_s7 = scalar_lea.vmem %s2693_s1, %s1812_s29  ;;  %s2150_s10 = scalar_lea.vmem %s2692_s0, %s1812_s29 }
  0x15   : > { %v2153_v0 = vld [vmem:[%s2145_s7] sm:$0xff]  ;;  %v765_v1 = vld [vmem:[%s2145_s7 + $0x8] sm:$0x1]  ;;  %s2162_s13 = scalar_lea.vmem %s2694_s2, %s1812_s29  ;;  %v414_v8 = vld [vmem:[%s2150_s10 + $0x50] sm:$0x1] }
  0x16   : > { %v2157_v2 = vld [vmem:[%s2150_s10] sm:$0xff]  ;;  %v835_v3 = vunpack.c.l.b16 %v765_v1  ;;  %v396_v4 = vld [vmem:[%s2150_s10 + $0x8] sm:$0x1]  ;;  %v963_v10 = vrot.slane %v2153_v0, 1  ;;  %v472_v11 = vunpack.c.l.b16 %v414_v8  ;;  %v854_v23 = vshll.u32 %v2153_v0, 16  ;;  %v2190_v42 = vld [vmem:[%s2145_s7 + $0xc] sm:$0xff] }
  0x17   : > { %v1161_v5 = vld [vmem:[%s2162_s13 + $0x8] sm:$0x1]  ;;  %v466_v6 = vunpack.c.l.b16 %v396_v4  ;;  %v596_v13 = vrot.slane %v2157_v2, 1  ;;  %v2170_v14 = vld [vmem:[%s2162_s13] sm:$0xff]  ;;  %v486_v25 = vshll.u32 %v2157_v2, 16  ;;  %v852_v32 = vshrl.u32 %v2153_v0, 16 }
  0x18   : > { %v1231_v7 = vunpack.c.l.b16 %v1161_v5  ;;  %v843_v9 = vpack.c.b16 %v835_v3, %v835_v3  ;;  %v2173_v18 = vld [vmem:[%s2150_s10 + $0x48] sm:$0xff]  ;;  %v480_v19 = vpack.c.b16 %v472_v11, %v472_v11  ;;  %v1359_v22 = vrot.slane %v2170_v14, 1  ;;  %v768_v31 = vld [vmem:[%s2145_s7 + $0x14] sm:$0x1]  ;;  %v417_v61 = vld [vmem:[%s2150_s10 + $0x5c] sm:$0x1] }
  0x19   : > { %v474_v12 = vpack.c.b16 %v466_v6, %v466_v6  ;;  %v556_v26 = vshrl.u32 %v2173_v18, 16  ;;  %v558_v27 = vshll.u32 %v2173_v18, 16  ;;  %v614_v28 = vrot.slane %v2173_v18, 1  ;;  %v399_v49 = vld [vmem:[%s2150_s10 + $0x14] sm:$0x1]  ;;  %v2207_v63 = vld [vmem:[%s2150_s10 + $0xc] sm:$0xff] }
  0x1a   : > { %v964_v15 = vrot.slane %v843_v9, 1  ;;  %v1239_v16 = vpack.c.b16 %v1231_v7, %v1231_v7  ;;  %v615_v29 = vrot.slane %v480_v19, 1  ;;  %v563_v30 = vshll.u32 %v480_v19, 16  ;;  %v1164_v56 = vld [vmem:[%s2162_s13 + $0x14] sm:$0x1]  ;;  %v2213_v7 = vld [vmem:[%s2162_s13 + $0xc] sm:$0xff] }
  0x1b   : > { %v597_v17 = vrot.slane %v474_v12, 1  ;;  %v859_v33 = vshll.u32 %v843_v9, 16  ;;  %v560_v34 = vrot.slane %v558_v27, 1  ;;  %v856_v35 = vrot.slane %v854_v23, 1 }
  0x1c   : > { %v965_v20 = vsel %vm595_vm0, %v963_v10, %v964_v15  ;;  %v1360_v24 = vrot.slane %v1239_v16, 1  ;;  %v484_v36 = vshrl.u32 %v2157_v2, 16  ;;  %v491_v37 = vshll.u32 %v474_v12, 16  ;;  %v2217_v10 = vld [vmem:[%s2150_s10 + $0x54] sm:$0xff] }
  0x1d   : > { %987 = vrot.lane.b32.xlu1 %v965_v20, %s2074_s14  ;;  %v598_v21 = vsel %vm595_vm0, %v596_v13, %v597_v17  ;;  %v565_v38 = vrot.slane %v563_v30, 1  ;;  %v488_v40 = vrot.slane %v486_v25, 1  ;;  %v561_v41 = vor.u32 %v560_v34, %v556_v26  ;;  %v402_v26 = vld [vmem:[%s2150_s10 + $0x20] sm:$0x1] }
  0x1e   : > { %620 = vrot.lane.b32.xlu0 %v598_v21, %s2074_s14  ;;  %v1361_v39 = vsel %vm595_vm0, %v1359_v22, %v1360_v24  ;;  %v836_v43 = vunpack.c.l.b16 %v768_v31  ;;  %v616_v44 = vsel %vm595_vm0, %v614_v28, %v615_v29  ;;  %v1248_v45 = vshrl.u32 %v2170_v14, 16  ;;  %v2230_v31 = vld [vmem:[%s2150_s10 + $0x18] sm:$0xff] }
  0x1f   : > { %v1250_v46 = vshll.u32 %v2170_v14, 16  ;;  %v1255_v47 = vshll.u32 %v1239_v16, 16  ;;  %v566_v48 = vsel %vm482_vm1, %v561_v41, %v565_v38  ;;  %v857_v50 = vor.u32 %v856_v35, %v852_v32 }
  0x20   : > { %v861_v51 = vrot.slane %v859_v33, 1  ;;  %591 = vrot.lane.b32.xlu2 %v566_v48, %s2075_s15  ;;  %v2200_v53 = vpack.c.b16 %v836_v43, %v836_v43  ;;  %v866_v54 = vshll.u32 %v2190_v42, 16  ;;  %v489_v57 = vor.u32 %v488_v40, %v484_v36 }
  0x21   : > { %v1252_v52 = vrot.slane %v1250_v46, 1  ;;  %v1257_v55 = vrot.slane %v1255_v47, 1  ;;  %v493_v58 = vrot.slane %v491_v37, 1  ;;  %v467_v59 = vunpack.c.l.b16 %v399_v49  ;;  %v771_v49 = vld [vmem:[%s2145_s7 + $0x20] sm:$0x1] }
  0x22   : > { %v862_v62 = vsel %vm482_vm1, %v857_v50, %v861_v51  ;;  %v1232_v1 = vunpack.c.l.b16 %v1164_v56  ;;  %v864_v3 = vshrl.u32 %v2190_v42, 16  ;;  %v868_v4 = vrot.slane %v866_v54, 1 }
  0x23   : > { %v1253_v60 = vor.u32 %v1252_v52, %v1248_v45  ;;  %v871_v5 = vshll.u32 %v2200_v53, 16  ;;  %v494_v8 = vsel %vm482_vm1, %v489_v57, %v493_v58  ;;  %v475_v9 = vpack.c.b16 %v467_v59, %v467_v59  ;;  %v2248_v57 = vld [vmem:[%s2145_s7 + $0x18] sm:$0xff] }
  0x24   : > { %v473_v11 = vunpack.c.l.b16 %v417_v61  ;;  %v496_v12 = vshrl.u32 %v2207_v63, 16  ;;  %v498_v13 = vshll.u32 %v2207_v63, 16  ;;  %v599_v15 = vrot.slane %v2207_v63, 1 }
  0x25   : > { %1383 = vrot.lane.b32.xlu1 %v1361_v39, %s2074_s14  ;;  %v1258_v6 = vsel %vm482_vm1, %v1253_v60, %v1257_v55  ;;  %v1240_v16 = vpack.c.b16 %v1232_v1, %v1232_v1  ;;  %v503_v17 = vshll.u32 %v475_v9, 16  ;;  %v869_v19 = vor.u32 %v868_v4, %v864_v3 }
  0x26   : > { %632 = vrot.lane.b32.xlu0 %v616_v44, %s2074_s14  ;;  %v873_v20 = vrot.slane %v871_v5, 1  ;;  %v1262_v21 = vshll.u32 %v2213_v7, 16  ;;  %v500_v22 = vrot.slane %v498_v13, 1  ;;  %v600_v23 = vrot.slane %v475_v9, 1  ;;  %v1167_v5 = vld [vmem:[%s2162_s13 + $0x20] sm:$0x1] }
  0x27   : > { %v481_v24 = vpack.c.b16 %v473_v11, %v473_v11  ;;  %v570_v25 = vshll.u32 %v2217_v10, 16  ;;  %v505_v27 = vrot.slane %v503_v17, 1  ;;  %v1260_v29 = vshrl.u32 %v2213_v7, 16 }
  0x28   : > { %1343 = vrot.lane.b32.xlu2 %v1258_v6, %s2075_s15  ;;  %v501_v28 = vor.u32 %v500_v22, %v496_v12  ;;  %v1267_v30 = vshll.u32 %v1240_v16, 16  ;;  %v874_v32 = vsel %vm482_vm1, %v869_v19, %v873_v20  ;;  %v1264_v33 = vrot.slane %v1262_v21, 1  ;;  %v783_v6 = vld [vmem:[%s2145_s7 + $0x50] sm:$0x1]  ;;  %v2266_v19 = vld [vmem:[%s2145_s7 + $0x48] sm:$0xff] }
  0x29   : > { %v468_v34 = vunpack.c.l.b16 %v402_v26  ;;  %v601_v36 = vsel %vm595_vm0, %v599_v15, %v600_v23  ;;  %v568_v37 = vshrl.u32 %v2217_v10, 16  ;;  %v572_v38 = vrot.slane %v570_v25, 1 }
  0x2a   : > { %v506_v35 = vsel %vm482_vm1, %v501_v28, %v505_v27  ;;  %v575_v39 = vshll.u32 %v481_v24, 16  ;;  %v1269_v40 = vrot.slane %v1267_v30, 1  ;;  %v510_v41 = vshll.u32 %v2230_v31, 16 }
  0x2b   : > { %v1265_v43 = vor.u32 %v1264_v33, %v1260_v29  ;;  %v476_v44 = vpack.c.b16 %v468_v34, %v468_v34  ;;  %v966_v45 = vrot.slane %v2190_v42, 1  ;;  %v967_v46 = vrot.slane %v2200_v53, 1 }
  0x2c   : > { %v573_v47 = vor.u32 %v572_v38, %v568_v37  ;;  %v577_v48 = vrot.slane %v575_v39, 1  ;;  %v508_v50 = vshrl.u32 %v2230_v31, 16  ;;  %v512_v52 = vrot.slane %v510_v41, 1 }
  0x2d   : > { %947 = vrot.lane.b32.xlu1 %v862_v62, %s2075_s15  ;;  %v1270_v51 = vsel %vm482_vm1, %v1265_v43, %v1269_v40  ;;  %v515_v54 = vshll.u32 %v476_v44, 16  ;;  %v968_v55 = vsel %vm595_vm0, %v966_v45, %v967_v46  ;;  %v837_v58 = vunpack.c.l.b16 %v771_v49  ;;  %v2282_v43 = vld [vmem:[%s2150_s10 + $0x24] sm:$0xff] }
  0x2e   : > { %579 = vrot.lane.b32.xlu0 %v494_v8, %s2075_s15  ;;  %v578_v56 = vsel %vm482_vm1, %v573_v47, %v577_v48  ;;  %v1362_v53 = vrot.slane %v2213_v7, 1  ;;  %v1363_v59 = vrot.slane %v1240_v16, 1  ;;  %v513_v60 = vor.u32 %v512_v52, %v508_v50  ;;  %v2263_v16 = vld [vmem:[%s2162_s13 + $0x18] sm:$0xff] }
  0x2f   : > { %v517_v61 = vrot.slane %v515_v54, 1  ;;  %v617_v62 = vrot.slane %v2217_v10, 1  ;;  %v618_v1 = vrot.slane %v481_v24, 1  ;;  %v845_v3 = vpack.c.b16 %v837_v58, %v837_v58  ;;  %v786_v47 = vld [vmem:[%s2145_s7 + $0x5c] sm:$0x1] }
  0x30   : > { %581 = vrot.lane.b32.xlu2 %v506_v35, %s2075_s15  ;;  %v878_v4 = vshll.u32 %v2248_v57, 16  ;;  %v1364_v9 = vsel %vm595_vm0, %v1362_v53, %v1363_v59  ;;  %v876_v12 = vshrl.u32 %v2248_v57, 16  ;;  %v1233_v17 = vunpack.c.l.b16 %v1167_v5  ;;  %v774_v58 = vld [vmem:[%s2145_s7 + $0x2c] sm:$0x1] }
  0x31   : > { %v518_v8 = vsel %vm482_vm1, %v513_v60, %v517_v61  ;;  %v619_v11 = vsel %vm595_vm0, %v617_v62, %v618_v1  ;;  %v883_v15 = vshll.u32 %v845_v3, 16  ;;  %v841_v20 = vunpack.c.l.b16 %v783_v6 }
  0x32   : > { %v880_v13 = vrot.slane %v878_v4, 1  ;;  %v969_v21 = vrot.slane %v2248_v57, 1  ;;  %v970_v22 = vrot.slane %v845_v3, 1  ;;  %v602_v23 = vrot.slane %v2230_v31, 1  ;;  %v2299_v3 = vld [vmem:[%s2145_s7 + $0x24] sm:$0xff] }
  0x33   : > { %v603_v24 = vrot.slane %v476_v44, 1  ;;  %v926_v25 = vshll.u32 %v2266_v19, 16  ;;  %v885_v27 = vrot.slane %v883_v15, 1  ;;  %v1241_v28 = vpack.c.b16 %v1233_v17, %v1233_v17 }
  0x34   : > { %v881_v26 = vor.u32 %v880_v13, %v876_v12  ;;  %v1274_v29 = vshll.u32 %v2263_v16, 16  ;;  %v849_v30 = vpack.c.b16 %v841_v20, %v841_v20  ;;  %v971_v33 = vsel %vm595_vm0, %v969_v21, %v970_v22 }
  0x35   : > { %949 = vrot.lane.b32.xlu1 %v874_v32, %s2075_s15  ;;  %v405_v32 = vld [vmem:[%s2150_s10 + $0x2c] sm:$0x1]  ;;  %v1272_v34 = vshrl.u32 %v2263_v16, 16  ;;  %v604_v35 = vsel %vm595_vm0, %v602_v23, %v603_v24  ;;  %v928_v37 = vrot.slane %v926_v25, 1  ;;  %v1279_v41 = vshll.u32 %v1241_v28, 16 }
  0x36   : > { %622 = vrot.lane.b32.xlu0 %v601_v36, %s2074_s14  ;;  %v924_v36 = vshrl.u32 %v2266_v19, 16  ;;  %v931_v38 = vshll.u32 %v849_v30, 16  ;;  %v886_v39 = vsel %vm482_vm1, %v881_v26, %v885_v27  ;;  %v1276_v40 = vrot.slane %v1274_v29, 1  ;;  %v1170_v25 = vld [vmem:[%s2162_s13 + $0x2c] sm:$0x1] }
  0x37   : > { %v469_v44 = vunpack.c.l.b16 %v405_v32  ;;  %v981_v45 = vrot.slane %v2266_v19, 1  ;;  %v982_v46 = vrot.slane %v849_v30, 1  ;;  %v522_v54 = vshll.u32 %v2282_v43, 16  ;;  %v2318_v32 = vld [vmem:[%s2162_s13 + $0x24] sm:$0xff] }
  0x38   : > { %989 = vrot.lane.b32.xlu2 %v968_v55, %s2074_s14  ;;  %v929_v48 = vor.u32 %v928_v37, %v924_v36  ;;  %v933_v49 = vrot.slane %v931_v38, 1  ;;  %v1277_v50 = vor.u32 %v1276_v40, %v1272_v34  ;;  %v2291_v55 = vld [vmem:[%s2145_s7 + $0x54] sm:$0xff]  ;;  %v520_v61 = vshrl.u32 %v2282_v43, 16 }
  0x39   : > { %v477_v52 = vpack.c.b16 %v469_v44, %v469_v44  ;;  %v983_v53 = vsel %vm595_vm0, %v981_v45, %v982_v46  ;;  %v524_v62 = vrot.slane %v522_v54, 1  ;;  %v838_v4 = vunpack.c.l.b16 %v774_v58  ;;  %v777_v36 = vld [vmem:[%s2145_s7 + $0x38] sm:$0x1]  ;;  %v2328_v46 = vld [vmem:[%s2145_s7 + $0x30] sm:$0xff] }
  0x3a   : > { %v934_v59 = vsel %vm482_vm1, %v929_v48, %v933_v49  ;;  %v605_v5 = vrot.slane %v2282_v43, 1  ;;  %v1366_v12 = vrot.slane %v1241_v28, 1  ;;  %v890_v13 = vshll.u32 %v2299_v3, 16  ;;  %v408_v48 = vld [vmem:[%s2150_s10 + $0x38] sm:$0x1] }
  0x3b   : > { %v527_v1 = vshll.u32 %v477_v52, 16  ;;  %v606_v6 = vrot.slane %v477_v52, 1  ;;  %v525_v15 = vor.u32 %v524_v62, %v520_v61  ;;  %v846_v20 = vpack.c.b16 %v838_v4, %v838_v4  ;;  %v1179_v62 = vld [vmem:[%s2162_s13 + $0x50] sm:$0x1] }
  0x3c   : > { %v936_v22 = vshrl.u32 %v2291_v55, 16  ;;  %v888_v27 = vshrl.u32 %v2299_v3, 16  ;;  %v892_v29 = vrot.slane %v890_v13, 1  ;;  %v972_v40 = vrot.slane %v2299_v3, 1  ;;  %v2350_v13 = vld [vmem:[%s2162_s13 + $0x48] sm:$0xff] }
  0x3d   : > { %1345 = vrot.lane.b32.xlu1 %v1270_v51, %s2075_s15  ;;  %v1281_v51 = vrot.slane %v1279_v41, 1  ;;  %v529_v17 = vrot.slane %v527_v1, 1  ;;  %v607_v21 = vsel %vm595_vm0, %v605_v5, %v606_v6  ;;  %v895_v28 = vshll.u32 %v846_v20, 16 }
  0x3e   : > { %593 = vrot.lane.b32.xlu0 %v578_v56, %s2075_s15  ;;  %v842_v56 = vunpack.c.l.b16 %v786_v47  ;;  %v893_v37 = vor.u32 %v892_v29, %v888_v27  ;;  %v973_v41 = vrot.slane %v846_v20, 1  ;;  %v839_v47 = vunpack.c.l.b16 %v777_v36  ;;  %v2359_v27 = vld [vmem:[%s2162_s13 + $0x30] sm:$0xff] }
  0x3f   : > { %v1282_v60 = vsel %vm482_vm1, %v1277_v50, %v1281_v51  ;;  %v530_v30 = vsel %vm482_vm1, %v525_v15, %v529_v17  ;;  %v897_v38 = vrot.slane %v895_v28, 1  ;;  %v1284_v50 = vshrl.u32 %v2318_v32, 16  ;;  %v1173_v15 = vld [vmem:[%s2162_s13 + $0x38] sm:$0x1] }
  0x40   : > { %634 = vrot.lane.b32.xlu2 %v619_v11, %s2074_s14  ;;  %v1365_v11 = vrot.slane %v2263_v16, 1  ;;  %v974_v54 = vsel %vm595_vm0, %v972_v40, %v973_v41  ;;  %v902_v61 = vshll.u32 %v2328_v46, 16  ;;  %v984_v6 = vrot.slane %v2291_v55, 1 }
  0x41   : > { %v898_v49 = vsel %vm482_vm1, %v893_v37, %v897_v38  ;;  %v900_v17 = vshrl.u32 %v2328_v46, 16  ;;  %v1235_v29 = vunpack.c.l.b16 %v1173_v15  ;;  %v1322_v28 = vshll.u32 %v2350_v13, 16 }
  0x42   : > { %v1367_v26 = vsel %vm595_vm0, %v1365_v11, %v1366_v12  ;;  %v904_v20 = vrot.slane %v902_v61, 1  ;;  %v1298_v41 = vshll.u32 %v2359_v27, 16  ;;  %v1967_v61 = vld [vmem:[%s2695_s3] sm:$0x30]  ;;  %v975_v15 = vrot.slane %v2328_v46, 1 }
  0x43   : > { %v2369_v40 = vpack.c.b16 %v1235_v29, %v1235_v29 }
  0x45   : > { %583 = vrot.lane.b32.xlu1 %v518_v8, %s2075_s15  ;;  %v2303_v8 = vpack.c.b16 %v842_v56, %v842_v56  ;;  %v1368_v56 = vrot.slane %v2318_v32, 1 }
  0x46   : > { %1385 = vrot.lane.b32.xlu0 %v1364_v9, %s2074_s14  ;;  %v938_v9 = vshll.u32 %v2291_v55, 16 }
  0x47   : > { %v943_v24 = vshll.u32 %v2303_v8, 16 }
  0x48   : > { %624 = vrot.lane.b32.xlu2 %v604_v35, %s2074_s14  ;;  %v940_v23 = vrot.slane %v938_v9, 1  ;;  %v985_v9 = vrot.slane %v2303_v8, 1 }
  0x49   : > { %v945_v35 = vrot.slane %v943_v24, 1 }
  0x4a   : > { %v941_v34 = vor.u32 %v940_v23, %v936_v22  ;;  %v1237_v22 = vunpack.c.l.b16 %v1179_v62  ;;  %v986_v8 = vsel %vm595_vm0, %v984_v6, %v985_v9 }
  0x4c   : > { %v946_v45 = vsel %vm482_vm1, %v941_v34, %v945_v35  ;;  %v2365_v34 = vpack.c.b16 %v1237_v22, %v1237_v22  ;;  %v411_v35 = vld [vmem:[%s2150_s10 + $0x44] sm:$0x1] }
  0x4d   : > { %991 = vrot.lane.b32.xlu1 %v971_v33, %s2074_s14  ;;  %v1234_v33 = vunpack.c.l.b16 %v1170_v25 }
  0x4e   : > { %951 = vrot.lane.b32.xlu0 %v886_v39, %s2075_s15  ;;  %v1286_v39 = vshll.u32 %v2318_v32, 16 }
  0x4f   : > { %v1242_v44 = vpack.c.b16 %v1234_v33, %v1234_v33 }
  0x50   : > { %959 = vrot.lane.b32.xlu2 %v934_v59, %s2075_s15  ;;  %v1288_v51 = vrot.slane %v1286_v39, 1  ;;  %v470_v59 = vunpack.c.l.b16 %v408_v48  ;;  %v471_v48 = vunpack.c.l.b16 %v411_v35  ;;  %v2420_v35 = vld [vmem:[%s2145_s7 + $0x3c] sm:$0xff] }
  0x51   : > { %v1291_v52 = vshll.u32 %v1242_v44, 16  ;;  %v1369_v58 = vrot.slane %v1242_v44, 1  ;;  %v1320_v44 = vshrl.u32 %v2350_v13, 16 }
  0x52   : > { %v1289_v1 = vor.u32 %v1288_v51, %v1284_v50  ;;  %v478_v12 = vpack.c.b16 %v470_v59, %v470_v59  ;;  %v1327_v50 = vshll.u32 %v2365_v34, 16  ;;  %v1296_v51 = vshrl.u32 %v2359_v27, 16  ;;  %v1855_v59 = vld [vmem:[%s2695_s3] sm:$0xf] }
  0x53   : > { %v1293_v4 = vrot.slane %v1291_v52, 1  ;;  %v1370_v11 = vsel %vm595_vm0, %v1368_v56, %v1369_v58  ;;  %v1300_v56 = vrot.slane %v1298_v41, 1  ;;  %v1303_v58 = vshll.u32 %v2369_v40, 16 }
  0x54   : > { %v609_v39 = vrot.slane %v478_v12, 1  ;;  %v2395_v6 = vpack.c.b16 %v471_v48, %v471_v48  ;;  %v1371_v48 = vrot.slane %v2359_v27, 1 }
  0x55   : > { %999 = vrot.lane.b32.xlu1 %v983_v53, %s2074_s14  ;;  %v2336_v53 = vld [vmem:[%s2150_s10 + $0x30] sm:$0xff]  ;;  %v1294_v23 = vsel %vm482_vm1, %v1289_v1, %v1293_v4  ;;  %v1856_v1 = vor.u32 %v1967_v61, %v1855_v59  ;;  %v1305_v22 = vrot.slane %v1303_v58, 1  ;;  %v912_v61 = vshrl.u32 %v2420_v35, 16 }
  0x56   : > { %1347 = vrot.lane.b32.xlu0 %v1282_v60, %s2075_s15  ;;  %v2339_v60 = vpack.c.b16 %v839_v47, %v839_v47  ;;  %v534_v5 = vshll.u32 %v2336_v53, 16  ;;  %v532_v24 = vshrl.u32 %v2336_v53, 16  ;;  %v608_v38 = vrot.slane %v2336_v53, 1  ;;  %v2374_v47 = vld [vmem:[%s2150_s10 + $0x3c] sm:$0xff]  ;;  %v1947_v4 = vld [vmem:[%s2695_s3 + $0x10] sm:$0xf] }
  0x57   : > { %v546_v9 = vshll.u32 %v2374_v47, 16 }
  0x58   : > { %1387 = vrot.lane.b32.xlu2 %v1367_v26, %s2074_s14  ;;  %v536_v25 = vrot.slane %v534_v5, 1  ;;  %v539_v26 = vshll.u32 %v478_v12, 16  ;;  %v1985_v5 = vld [vmem:[%s2695_s3 + $0x10] sm:$0x30]  ;;  %v1329_v12 = vrot.slane %v1327_v50, 1 }
  0x5a   : > { %v537_v36 = vor.u32 %v536_v25, %v532_v24  ;;  %v541_v37 = vrot.slane %v539_v26, 1  ;;  %v780_v24 = vld [vmem:[%s2145_s7 + $0x44] sm:$0x1]  ;;  %v544_v25 = vshrl.u32 %v2374_v47, 16  ;;  %v548_v26 = vrot.slane %v546_v9, 1  ;;  %s1818_s7 = sshll.u32 %s2711_s25, 1 }
  0x5b   : > { %s389_s12 = sadd.s32 %s1819_s11, %s1818_s7 }
  0x5c   : > { %v542_v52 = vsel %vm482_vm1, %v537_v36, %v541_v37  ;;  %v840_v36 = vunpack.c.l.b16 %v780_v24  ;;  %s1820_s25 = sshll.u32 %s389_s12, 3 }
  0x5d   : > { %626 = vrot.lane.b32.xlu1 %v607_v21, %s2074_s14  ;;  %v907_v21 = vshll.u32 %v2339_v60, 16  ;;  %s2592_s16 = scalar_lea.vmem %s2697_s5, %s1820_s25 }
  0x5e   : > { %585 = vrot.lane.b32.xlu0 %v530_v30, %s2075_s15  ;;  %v905_v30 = vor.u32 %v904_v20, %v900_v17  ;;  %v976_v17 = vrot.slane %v2339_v60, 1  ;;  %v696_v20 = vsel %vm694_vm2, %v1856_v1, 0  ;;  %v848_v50 = vpack.c.b16 %v840_v36, %v840_v36  ;;  %v2440_v1 = vld [vmem:[%s2162_s13 + $0x54] sm:$0xff] }
  0x5f   : > { %v909_v33 = vrot.slane %v907_v21, 1  ;;  %v1301_v21 = vor.u32 %v1300_v56, %v1296_v51  ;;  %1986 = vmatpush.bf16.msra.mxu3 %v696_v20  ;;  %705 = vmatpush.bf16.msra.mxu0 %v696_v20  ;;  %v914_v51 = vshll.u32 %v2420_v35, 16  ;;  %v1176_v56 = vld [vmem:[%s2162_s13 + $0x44] sm:$0x1] }
  0x60   : > { %953 = vrot.lane.b32.xlu2 %v898_v49, %s2075_s15  ;;  %v977_v29 = vsel %vm595_vm0, %v975_v15, %v976_v17  ;;  %v1236_v9 = vunpack.c.l.b16 %v1176_v56  ;;  %v611_v15 = vrot.slane %v2374_v47, 1  ;;  %v612_v17 = vrot.slane %v2395_v6, 1 }
  0x61   : > { %v910_v49 = vsel %vm482_vm1, %v905_v30, %v909_v33  ;;  %v1976_v30 = vld [vmem:[%s2695_s3 + $0x8] sm:$0x30]  ;;  %v1306_v33 = vsel %vm482_vm1, %v1301_v21, %v1305_v22 }
  0x65   : > { %961 = vrot.lane.b32.xlu1 %v946_v45, %s2075_s15  ;;  %v1324_v45 = vrot.slane %v1322_v28, 1  ;;  %v1901_v28 = vld [vmem:[%s2695_s3 + $0x8] sm:$0xf] }
  0x66   : > { %993 = vrot.lane.b32.xlu0 %v974_v54, %s2074_s14  ;;  %v610_v54 = vsel %vm595_vm0, %v608_v38, %v609_v39  ;;  %v1902_v37 = vor.u32 %v1976_v30, %v1901_v28  ;;  %v549_v38 = vor.u32 %v548_v26, %v544_v25  ;;  %v1334_v25 = vshll.u32 %v2440_v1, 16 }
  0x67   : > { %v1325_v62 = vor.u32 %v1324_v45, %v1320_v44  ;;  %v1377_v44 = vrot.slane %v2350_v13, 1  ;;  %v1378_v45 = vrot.slane %v2365_v34, 1 }
  0x68   : > { %1349 = vrot.lane.b32.xlu2 %v1294_v23, %s2075_s15  ;;  %v1060_v41 = vsel %vm694_vm2, %v1902_v37, 0  ;;  %v1336_v37 = vrot.slane %v1334_v25, 1 }
  0x69   : > { %v1330_v60 = vsel %vm482_vm1, %v1325_v62, %v1329_v12  ;;  %1069 = vmatpush.bf16.msra.mxu1 %v1060_v41  ;;  %1987 = vmatpush.bf16.msrb.mxu3 %v1060_v41  ;;  %v1379_v59 = vsel %vm595_vm0, %v1377_v44, %v1378_v45  ;;  %v916_v62 = vrot.slane %v914_v51, 1  ;;  %v979_v12 = vrot.slane %v848_v50, 1 }
  0x6b   : > { %v917_v21 = vor.u32 %v916_v62, %v912_v61  ;;  %v1380_v61 = vrot.slane %v2440_v1, 1 }
  0x6d   : > { %1389 = vrot.lane.b32.xlu1 %v1370_v11, %s2074_s14  ;;  %v1948_v11 = vor.u32 %v1985_v5, %v1947_v4  ;;  %v2443_v5 = vld [vmem:[%s2162_s13 + $0x3c] sm:$0xff] }
  0x6e   : > { %1001 = vrot.lane.b32.xlu0 %v986_v8, %s2074_s14  ;;  %v551_v8 = vshll.u32 %v2395_v6, 16  ;;  %v1310_v20 = vshll.u32 %v2443_v5, 16  ;;  %v1308_v28 = vshrl.u32 %v2443_v5, 16  ;;  %v1332_v6 = vshrl.u32 %v2440_v1, 16 }
  0x6f   : > { %v2404_v23 = vsel %vm694_vm2, %v1948_v11, 0  ;;  %v978_v11 = vrot.slane %v2420_v35, 1 }
  0x70   : > { %587 = vrot.lane.b32.xlu2 %v542_v52, %s2075_s15  ;;  %1465 = vmatpush.bf16.msra.mxu2 %v2404_v23  ;;  %v553_v39 = vrot.slane %v551_v8, 1  ;;  %v1244_v8 = vpack.c.b16 %v1236_v9, %v1236_v9  ;;  %v1312_v30 = vrot.slane %v1310_v20, 1 }
  0x72   : > { %v554_v58 = vsel %vm482_vm1, %v549_v38, %v553_v39  ;;  %v1374_v39 = vrot.slane %v2443_v5, 1  ;;  %v1375_v41 = vrot.slane %v1244_v8, 1  ;;  %v1313_v44 = vor.u32 %v1312_v30, %v1308_v28 }
  0x74   : > { %v1376_v56 = vsel %vm595_vm0, %v1374_v39, %v1375_v41 }
  0x75   : > { %955 = vrot.lane.b32.xlu1 %v910_v49, %s2075_s15  ;;  %v1372_v49 = vrot.slane %v2369_v40, 1  ;;  %v919_v40 = vshll.u32 %v848_v50, 16 }
  0x76   : > { %628 = vrot.lane.b32.xlu0 %v610_v54, %s2074_s14  ;;  %v1182_v54 = vld [vmem:[%s2162_s13 + $0x5c] sm:$0x1] }
  0x77   : > { %v1373_v34 = vsel %vm595_vm0, %v1371_v48, %v1372_v49  ;;  %v1238_v4 = vunpack.c.l.b16 %v1182_v54  ;;  %v921_v22 = vrot.slane %v919_v40, 1  ;;  %v1337_v49 = vor.u32 %v1336_v37, %v1332_v6 }
  0x78   : > { %995 = vrot.lane.b32.xlu2 %v977_v29, %s2074_s14  ;;  %v613_v29 = vsel %vm595_vm0, %v611_v15, %v612_v17 }
  0x79   : > { %v1246_v24 = vpack.c.b16 %v1238_v4, %v1238_v4  ;;  %v922_v36 = vsel %vm482_vm1, %v917_v21, %v921_v22 }
  0x7a   : > { %v2431_v52 = vpop.permute.xlu2 %591 }
  0x7b   : > { %v1339_v38 = vshll.u32 %v1246_v24, 16  ;;  %v1381_v62 = vrot.slane %v1246_v24, 1  ;;  %v650_v9 = vsel %vm636_vm3, %v2173_v18, %v2431_v52 }
  0x7d   : > { %1355 = vrot.lane.b32.xlu1 %v1330_v60, %s2075_s15  ;;  %v980_v60 = vsel %vm595_vm0, %v978_v11, %v979_v12  ;;  %v1341_v50 = vrot.slane %v1339_v38, 1  ;;  %v1382_v15 = vsel %vm595_vm0, %v1380_v61, %v1381_v62 }
  0x7e   : > { %1351 = vrot.lane.b32.xlu0 %v1306_v33, %s2075_s15  ;;  %v1315_v33 = vshll.u32 %v1244_v8, 16 }
  0x80   : > { %1391 = vrot.lane.b32.xlu2 %v1373_v34, %s2074_s14  ;;  %v1317_v45 = vrot.slane %v1315_v33, 1 }
  0x82   : > { %v1344_v26 = vpop.permute.xlu2 %1343 }
  0x83   : > { %v1400_v34 = vsel %vm636_vm3, %v2170_v14, %v1344_v26 }
  0x85   : > { %589 = vrot.lane.b32.xlu1 %v554_v58, %s2075_s15  ;;  %v1318_v58 = vsel %vm482_vm1, %v1313_v44, %v1317_v45 }
  0x86   : > { %1395 = vrot.lane.b32.xlu0 %v1379_v59, %s2074_s14  ;;  %v1342_v59 = vsel %vm482_vm1, %v1337_v49, %v1341_v50 }
  0x88   : > { %630 = vrot.lane.b32.xlu2 %v613_v29, %s2074_s14 }
  0x8a   : > { %v582_v51 = vpop.permute.xlu2 %581 }
  0x8d   : > { %997 = vrot.lane.b32.xlu1 %v980_v60, %s2074_s14 }
  0x8e   : > { %957 = vrot.lane.b32.xlu0 %v922_v36, %s2075_s15 }
  0x8f   : > { %v988_v48 = vpop.permute.xlu1 %987 }
  0x90   : > { %v621_v54 = vpop.permute.xlu0 %620  ;;  %1353 = vrot.lane.b32.xlu2 %v1318_v58, %s2075_s15 }
  0x92   : > { %v990_v4 = vpop.permute.xlu2 %989 }
  0x95   : > { %1393 = vrot.lane.b32.xlu1 %v1376_v56, %s2074_s14 }
  0x96   : > { %1357 = vrot.lane.b32.xlu0 %v1342_v59, %s2075_s15 }
  0x97   : > { %v1384_v40 = vpop.permute.xlu1 %1383 }
  0x98   : > { %v633_v11 = vpop.permute.xlu0 %632  ;;  %v1416_v12 = vsel %vm653_vm4, %v1400_v34, %v1384_v40  ;;  %1397 = vrot.lane.b32.xlu2 %v1382_v15, %s2074_s14 }
  0x99   : > { %v667_v14 = vsel %vm653_vm4, %v650_v9, %v633_v11  ;;  %1949 = vmatmul.msk.bf16.vlgmr.msra.gmra.mxu2 %vm677_vm5, %v1416_v12 }
  0x9a   : > { %1863 = vmatmul.msk.bf16.vlgmr.msra.gmra.mxu3 %vm677_vm5, %v667_v14  ;;  %v635_v20 = vpop.permute.xlu2 %634 }
  0x9b   : > { %1988 = vmatpush.bf16.msra.mxu3 %v2404_v23 }
  0x9f   : > { %v948_v17 = vpop.permute.xlu1 %947 }
  0xa0   : > { %v1004_v18 = vsel %vm636_vm3, %v2153_v0, %v948_v17  ;;  %v580_v52 = vpop.permute.xlu0 %579 }
  0xa1   : > { %v638_v21 = vsel %vm636_vm3, %v2157_v2, %v580_v52  ;;  %v1020_v22 = vsel %vm653_vm4, %v1004_v18, %v988_v48  ;;  %v640_v2 = vsel %vm636_vm3, %v2207_v63, %v582_v51 }
  0xa2   : > { %v655_v24 = vsel %vm653_vm4, %v638_v21, %v621_v54  ;;  %1903 = vmatmul.msk.bf16.vlgmr.msra.gmra.mxu1 %vm677_vm5, %v1020_v22  ;;  %v625_v25 = vpop.permute.xlu2 %624 }
  0xa3   : > { %1857 = vmatmul.msk.bf16.vlgmr.msra.gmra.mxu0 %vm677_vm5, %v655_v24 }
  0xa7   : > { %v950_v23 = vpop.permute.xlu1 %949 }
  0xa8   : > { %v623_v26 = vpop.permute.xlu0 %622  ;;  %v1006_v8 = vsel %vm636_vm3, %v2190_v42, %v950_v23 }
  0xa9   : > { %v1022_v30 = vsel %vm653_vm4, %v1006_v8, %v990_v4  ;;  %v657_v33 = vsel %vm653_vm4, %v640_v2, %v623_v26 }
  0xaa   : > { %v960_v0 = vpop.permute.xlu2 %959 }
  0xaf   : > { %v1346_v60 = vpop.permute.xlu1 %1345 }
  0xb0   : > { %v594_v29 = vpop.permute.xlu0 %593  ;;  %v1402_v63 = vsel %vm636_vm3, %v2213_v7, %v1346_v60  ;;  %v1016_v7 = vsel %vm636_vm3, %v2266_v19, %v960_v0 }
  0xb1   : > { %v652_v28 = vsel %vm636_vm3, %v2217_v10, %v594_v29 }
  0xb2   : > { %v669_v36 = vsel %vm653_vm4, %v652_v28, %v635_v20  ;;  %1904 = vmatmul.msk.bf16.gmra.mxu1 %vm677_vm5, %v1022_v30  ;;  %v1388_v6 = vpop.permute.xlu2 %1387 }
  0xb3   : > { %1858 = vmatmul.msk.bf16.gmra.mxu0 %vm677_vm5, %v657_v33  ;;  %1864 = vmatmul.msk.bf16.gmra.mxu3 %vm677_vm5, %v669_v36 }
  0xb7   : > { %v584_v42 = vpop.permute.xlu1 %583 }
  0xb8   : > { %v1386_v37 = vpop.permute.xlu0 %1385  ;;  %v642_v38 = vsel %vm636_vm3, %v2230_v31, %v584_v42 }
  0xb9   : > { %v1418_v10 = vsel %vm653_vm4, %v1402_v63, %v1386_v37  ;;  %v659_v48 = vsel %vm653_vm4, %v642_v38, %v625_v25 }
  0xba   : > { %1950 = vmatmul.msk.bf16.gmra.mxu2 %vm677_vm5, %v1418_v10  ;;  %v954_v45 = vpop.permute.xlu2 %953 }
  0xbf   : > { %v992_v39 = vpop.permute.xlu1 %991 }
  0xc0   : > { %v952_v41 = vpop.permute.xlu0 %951 }
  0xc1   : > { %v1008_v44 = vsel %vm636_vm3, %v2248_v57, %v952_v41 }
  0xc2   : > { %v1024_v49 = vsel %vm653_vm4, %v1008_v44, %v992_v39  ;;  %v1350_v56 = vpop.permute.xlu2 %1349 }
  0xc3   : > { %1859 = vmatmul.msk.bf16.gmra.mxu0 %vm677_vm5, %v659_v48  ;;  %1905 = vmatmul.msk.bf16.gmra.mxu1 %vm677_vm5, %v1024_v49  ;;  %v1406_v9 = vsel %vm636_vm3, %v2318_v32, %v1350_v56 }
  0xc7   : > { %v1000_v50 = vpop.permute.xlu1 %999 }
  0xc8   : > { %v1032_v31 = vsel %vm653_vm4, %v1016_v7, %v1000_v50  ;;  %v1348_v51 = vpop.permute.xlu0 %1347 }
  0xc9   : > { %v1404_v54 = vsel %vm636_vm3, %v2263_v16, %v1348_v51  ;;  %1909 = vmatmul.msk.bf16.vlgmr.msrb.gmra.mxu3 %vm677_vm5, %v1032_v31  ;;  %v1010_v16 = vsel %vm636_vm3, %v2299_v3, %v954_v45 }
  0xca   : > { %v1420_v57 = vsel %vm653_vm4, %v1404_v54, %v1388_v6  ;;  %v588_v61 = vpop.permute.xlu2 %587 }
  0xcb   : > { %1951 = vmatmul.msk.bf16.gmra.mxu2 %vm677_vm5, %v1420_v57  ;;  %v646_v20 = vsel %vm636_vm3, %v2336_v53, %v588_v61 }
  0xcf   : > { %v627_v58 = vpop.permute.xlu1 %626 }
  0xd0   : > { %v586_v59 = vpop.permute.xlu0 %585 }
  0xd1   : > { %v644_v34 = vsel %vm636_vm3, %v2282_v43, %v586_v59  ;;  %v2583_v59 = vld [vmem:[%s2696_s4] ss:$0 sm:$0xff] }
  0xd2   : > { %v661_v19 = vsel %vm653_vm4, %v644_v34, %v627_v58  ;;  %v996_v12 = vpop.permute.xlu2 %995 }
  0xd3   : > { %1860 = vmatmul.msk.bf16.gmra.mxu0 %vm677_vm5, %v661_v19 }
  0xd7   : > { %v962_v62 = vpop.permute.xlu1 %961 }
  0xd8   : > { %v994_v40 = vpop.permute.xlu0 %993  ;;  %v1018_v43 = vsel %vm636_vm3, %v2291_v55, %v962_v62 }
  0xd9   : > { %v1026_v4 = vsel %vm653_vm4, %v1010_v16, %v994_v40 }
  0xda   : > { %1906 = vmatmul.msk.bf16.gmra.mxu1 %vm677_vm5, %v1026_v4  ;;  %v1392_v21 = vpop.permute.xlu2 %1391 }
  0xdf   : > { %v1390_v11 = vpop.permute.xlu1 %1389 }
  0xe0   : > { %v1002_v14 = vpop.permute.xlu0 %1001  ;;  %v1422_v15 = vsel %vm653_vm4, %v1406_v9, %v1390_v11 }
  0xe1   : > { %v1034_v17 = vsel %vm653_vm4, %v1018_v43, %v1002_v14  ;;  %1952 = vmatmul.msk.bf16.gmra.mxu2 %vm677_vm5, %v1422_v15 }
  0xe2   : > { %1910 = vmatmul.msk.bf16.gmra.mxu3 %vm677_vm5, %v1034_v17 }
  0xe7   : > { %v956_v3 = vpop.permute.xlu1 %955 }
  0xe8   : > { %v1012_v32 = vsel %vm636_vm3, %v2328_v46, %v956_v3  ;;  %v629_v18 = vpop.permute.xlu0 %628  ;;  %v631_v46 = vpop.permute.xlu2 %630 }
  0xe9   : > { %v663_v52 = vsel %vm653_vm4, %v646_v20, %v629_v18  ;;  %v1028_v55 = vsel %vm653_vm4, %v1012_v32, %v996_v12 }
  0xea   : > { %1861 = vmatmul.msk.bf16.gmra.mxu0 %vm677_vm5, %v663_v52  ;;  %1907 = vmatmul.msk.bf16.gmra.mxu1 %vm677_vm5, %v1028_v55 }
  0xef   : > { %v1356_v22 = vpop.permute.xlu1 %1355 }
  0xf0   : > { %v1352_v24 = vpop.permute.xlu0 %1351  ;;  %v1412_v26 = vsel %vm636_vm3, %v2350_v13, %v1356_v22 }
  0xf1   : > { %v1408_v23 = vsel %vm636_vm3, %v2359_v27, %v1352_v24  ;;  %v1354_v27 = vpop.permute.xlu2 %1353 }
  0xf2   : > { %v1424_v53 = vsel %vm653_vm4, %v1408_v23, %v1392_v21 }
  0xf3   : > { %1953 = vmatmul.msk.bf16.gmra.mxu2 %vm677_vm5, %v1424_v53 }
  0xf7   : > { %v590_v25 = vpop.permute.xlu1 %589 }
  0xf8   : > { %v648_v8 = vsel %vm636_vm3, %v2374_v47, %v590_v25  ;;  %v1396_v60 = vpop.permute.xlu0 %1395  ;;  %v1410_v47 = vsel %vm636_vm3, %v2443_v5, %v1354_v27 }
  0xf9   : > { %v1428_v0 = vsel %vm653_vm4, %v1412_v26, %v1396_v60  ;;  %v665_v29 = vsel %vm653_vm4, %v648_v8, %v631_v46  ;;  %v1398_v36 = vpop.permute.xlu2 %1397 }
  0xfa   : > { %1955 = vmatmul.msk.bf16.vlgmr.msra.gmra.mxu3 %vm677_vm5, %v1428_v0  ;;  %1862 = vmatmul.msk.bf16.gmra.mxu0 %vm677_vm5, %v665_v29 }
  0xff   : > { %v998_v2 = vpop.permute.xlu1 %997 }
 0x100   : > { %v958_v28 = vpop.permute.xlu0 %957 }
 0x101   : > { %v1014_v30 = vsel %vm636_vm3, %v2420_v35, %v958_v28 }
 0x102   : > { %v1030_v13 = vsel %vm653_vm4, %v1014_v30, %v998_v2 }
 0x103   : > { %1908 = vmatmul.msk.bf16.gmra.mxu1 %vm677_vm5, %v1030_v13 }
 0x107   : > { %v1394_v33 = vpop.permute.xlu1 %1393 }
 0x108   : > { %v1358_v42 = vpop.permute.xlu0 %1357  ;;  %v1426_v6 = vsel %vm653_vm4, %v1410_v47, %v1394_v33 }
 0x109   : > { %v1414_v63 = vsel %vm636_vm3, %v2440_v1, %v1358_v42  ;;  %1954 = vmatmul.msk.bf16.gmra.mxu2 %vm677_vm5, %v1426_v6 }
 0x10a   : > { %v1430_v37 = vsel %vm653_vm4, %v1414_v63, %v1398_v36 }
 0x10b   : > { %1956 = vmatmul.msk.bf16.gmra.mxu3 %vm677_vm5, %v1430_v37 }
 0x11c   : > { %v1467_v45 = vpop.f32.mrf.mxu2 }
 0x11d   : > { %v737_v35 = vpop.f32.mrf.mxu3 }
 0x11e   : > { %759 = vst.msk [vmem:[#allocation2 + $0x60] sm:$0xff] %vm653_vm4, %v737_v35 }
 0x11f   : > { %v1071_v10 = vpop.f32.mrf.mxu1 }
 0x120   : > { %v707_v38 = vpop.f32.mrf.mxu0 }
 0x121   : > { %747 = vst.msk [vmem:[#allocation2] sm:$0xff] %vm653_vm4, %v707_v38 }
 0x124   : > { %v1469_v54 = vpop.f32.mrf.mxu2 }
 0x125   : > { %v739_v5 = vpop.f32.mrf.mxu3  ;;  %v1123_v25 = vld [vmem:[#allocation2 + $0x60] sm:$0xff] }
 0x126   : > { %760 = vst.msk [vmem:[#allocation2 + $0x68] sm:$0xff] %vm653_vm4, %v739_v5 }
 0x127   : > { %v1073_v39 = vpop.f32.mrf.mxu1 }
 0x128   : > { %v1111_v1 = vld [vmem:[#allocation2] sm:$0xff]  ;;  %v709_v41 = vpop.f32.mrf.mxu0 }
 0x129   : > { %v1127_v44 = vadd.f32 %v1111_v1, %v1071_v10  ;;  %748 = vst.msk [vmem:[#allocation2 + $0x8] sm:$0xff] %vm653_vm4, %v709_v41 }
 0x12b   : > { %1143 = vst.msk [vmem:[#allocation2] sm:$0xff] %vm653_vm4, %v1127_v44 }
 0x12d   : > { %v1124_v36 = vld [vmem:[#allocation2 + $0x68] sm:$0xff] }
 0x12f   : > { %v1076_v50 = vpop.f32.mrf.mxu1 }
 0x130   : > { %v1112_v48 = vld [vmem:[#allocation2 + $0x8] sm:$0xff]  ;;  %v712_v49 = vpop.f32.mrf.mxu0 }
 0x131   : > { %v1128_v7 = vadd.f32 %v1112_v48, %v1073_v39  ;;  %749 = vst.msk [vmem:[#allocation2 + $0x10] sm:$0xff] %vm653_vm4, %v712_v49 }
 0x132   : > { %v1507_v31 = vld [vmem:[#allocation2] sm:$0xff] }
 0x133   : > { %v1523_v51 = vadd.f32 %v1507_v31, %v1467_v45  ;;  %1144 = vst.msk [vmem:[#allocation2 + $0x8] sm:$0xff] %vm653_vm4, %v1128_v7 }
 0x135   : > { %1539 = vst.msk [vmem:[#allocation2] sm:$0xff] %vm653_vm4, %v1523_v51 }
 0x136   : > { %v742_v57 = vpop.f32.mrf.mxu3 }
 0x137   : > { %761 = vst.msk [vmem:[#allocation2 + $0x70] sm:$0xff] %vm653_vm4, %v742_v57  ;;  %v1078_v62 = vpop.f32.mrf.mxu1 }
 0x138   : > { %v1113_v56 = vld [vmem:[#allocation2 + $0x10] sm:$0xff]  ;;  %v714_v58 = vpop.f32.mrf.mxu0 }
 0x139   : > { %v1129_v34 = vadd.f32 %v1113_v56, %v1076_v50  ;;  %750 = vst.msk [vmem:[#allocation2 + $0x18] sm:$0xff] %vm653_vm4, %v714_v58 }
 0x13a   : > { %v1508_v19 = vld [vmem:[#allocation2 + $0x8] sm:$0xff] }
 0x13b   : > { %v1524_v61 = vadd.f32 %v1508_v19, %v1469_v54  ;;  %1145 = vst.msk [vmem:[#allocation2 + $0x10] sm:$0xff] %vm653_vm4, %v1129_v34 }
 0x13c   : > { %v1555_v16 = vld [vmem:[#allocation2] sm:$0xff] }
 0x13d   : > { %v1575_v40 = vadd.f32 %v2583_v59, %v1555_v16  ;;  %1540 = vst.msk [vmem:[#allocation2 + $0x8] sm:$0xff] %vm653_vm4, %v1524_v61  ;;  %v1472_v4 = vpop.f32.mrf.mxu2 }
 0x13e   : > { %v744_v9 = vpop.f32.mrf.mxu3  ;;  %v1125_v57 = vld [vmem:[#allocation2 + $0x70] sm:$0xff] }
 0x13f   : > { %v1591_v11 = vmax.f32 %v1575_v40, 0.0  ;;  %762 = vst.msk [vmem:[#allocation2 + $0x78] sm:$0xff] %vm653_vm4, %v744_v9 }
 0x140   : > { %v1114_v12 = vld [vmem:[#allocation2 + $0x18] sm:$0xff]  ;;  %v717_v43 = vpop.f32.mrf.mxu0  ;;  %v1081_v32 = vpop.f32.mrf.mxu1 }
 0x141   : > { %1607 = vst.msk [vmem:[%s2592_s16] sm:$0xff] %vm653_vm4, %v1591_v11  ;;  %v1130_v14 = vadd.f32 %v1114_v12, %v1078_v62 }
 0x142   : > { %v1509_v15 = vld [vmem:[#allocation2 + $0x10] sm:$0xff]  ;;  %751 = vst.msk [vmem:[#allocation2 + $0x20] sm:$0xff] %vm653_vm4, %v717_v43 }
 0x143   : > { %1146 = vst.msk [vmem:[#allocation2 + $0x18] sm:$0xff] %vm653_vm4, %v1130_v14  ;;  %v1525_v17 = vadd.f32 %v1509_v15, %v1472_v4 }
 0x144   : > { %v1556_v3 = vld [vmem:[#allocation2 + $0x8] sm:$0xff] }
 0x145   : > { %v1576_v20 = vadd.f32 %v2583_v59, %v1556_v3  ;;  %1541 = vst.msk [vmem:[#allocation2 + $0x10] sm:$0xff] %vm653_vm4, %v1525_v17  ;;  %v1474_v52 = vpop.f32.mrf.mxu2 }
 0x146   : > { %v1126_v4 = vld [vmem:[#allocation2 + $0x78] sm:$0xff] }
 0x147   : > { %v1592_v18 = vmax.f32 %v1576_v20, 0.0 }
 0x148   : > { %v719_v55 = vpop.f32.mrf.mxu0  ;;  %v1083_v0 = vpop.f32.mrf.mxu1 }
 0x149   : > { %1608 = vst.msk [vmem:[%s2592_s16 + $0x8] sm:$0xff] %vm653_vm4, %v1592_v18  ;;  %v1115_v21 = vld [vmem:[#allocation2 + $0x20] sm:$0xff] }
 0x14a   : > { %v1131_v22 = vadd.f32 %v1115_v21, %v1081_v32  ;;  %v1510_v24 = vld [vmem:[#allocation2 + $0x18] sm:$0xff]  ;;  %752 = vst.msk [vmem:[#allocation2 + $0x28] sm:$0xff] %vm653_vm4, %v719_v55 }
 0x14b   : > { %v1526_v23 = vadd.f32 %v1510_v24, %v1474_v52 }
 0x14c   : > { %v1557_v53 = vld [vmem:[#allocation2 + $0x10] sm:$0xff]  ;;  %1147 = vst.msk [vmem:[#allocation2 + $0x20] sm:$0xff] %vm653_vm4, %v1131_v22  ;;  %v1101_v46 = vpop.f32.mrf.mxu3 }
 0x14d   : > { %v1577_v26 = vadd.f32 %v2583_v59, %v1557_v53  ;;  %1542 = vst.msk [vmem:[#allocation2 + $0x18] sm:$0xff] %vm653_vm4, %v1526_v23  ;;  %v1139_v8 = vadd.f32 %v1123_v25, %v1101_v46 }
 0x14e   : > { %v1477_v2 = vpop.f32.mrf.mxu2 }
 0x14f   : > { %v1593_v60 = vmax.f32 %v1577_v26, 0.0  ;;  %1155 = vst.msk [vmem:[#allocation2 + $0x60] sm:$0xff] %vm653_vm4, %v1139_v8 }
 0x150   : > { %v722_v29 = vpop.f32.mrf.mxu0 }
 0x151   : > { %1609 = vst.msk [vmem:[%s2592_s16 + $0x10] sm:$0xff] %vm653_vm4, %v1593_v60  ;;  %v1116_v27 = vld [vmem:[#allocation2 + $0x28] sm:$0xff] }
 0x152   : > { %v1132_v28 = vadd.f32 %v1116_v27, %v1083_v0  ;;  %753 = vst.msk [vmem:[#allocation2 + $0x30] sm:$0xff] %vm653_vm4, %v722_v29 }
 0x153   : > { %v1511_v30 = vld [vmem:[#allocation2 + $0x20] sm:$0xff] }
 0x154   : > { %v1558_v13 = vld [vmem:[#allocation2 + $0x18] sm:$0xff]  ;;  %1148 = vst.msk [vmem:[#allocation2 + $0x28] sm:$0xff] %vm653_vm4, %v1132_v28  ;;  %v1527_v47 = vadd.f32 %v1511_v30, %v1477_v2  ;;  %v1103_v33 = vpop.f32.mrf.mxu3 }
 0x155   : > { %v1578_v42 = vadd.f32 %v2583_v59, %v1558_v13  ;;  %v1140_v6 = vadd.f32 %v1124_v36, %v1103_v33 }
 0x156   : > { %1543 = vst.msk [vmem:[#allocation2 + $0x20] sm:$0xff] %vm653_vm4, %v1527_v47  ;;  %v1479_v5 = vpop.f32.mrf.mxu2  ;;  %v1519_v26 = vld [vmem:[#allocation2 + $0x60] sm:$0xff] }
 0x157   : > { %v1594_v63 = vmax.f32 %v1578_v42, 0.0  ;;  %1156 = vst.msk [vmem:[#allocation2 + $0x68] sm:$0xff] %vm653_vm4, %v1140_v6  ;;  %v1086_v37 = vpop.f32.mrf.mxu1 }
 0x158   : > { %v724_v35 = vpop.f32.mrf.mxu0 }
 0x159   : > { %1610 = vst.msk [vmem:[%s2592_s16 + $0x18] sm:$0xff] %vm653_vm4, %v1594_v63  ;;  %v1117_v10 = vld [vmem:[#allocation2 + $0x30] sm:$0xff] }
 0x15a   : > { %v1133_v38 = vadd.f32 %v1117_v10, %v1086_v37  ;;  %754 = vst.msk [vmem:[#allocation2 + $0x38] sm:$0xff] %vm653_vm4, %v724_v35 }
 0x15b   : > { %v1512_v39 = vld [vmem:[#allocation2 + $0x28] sm:$0xff] }
 0x15c   : > { %v1528_v1 = vadd.f32 %v1512_v39, %v1479_v5  ;;  %1149 = vst.msk [vmem:[#allocation2 + $0x30] sm:$0xff] %vm653_vm4, %v1133_v38 }
 0x15d   : > { %v1559_v41 = vld [vmem:[#allocation2 + $0x20] sm:$0xff] }
 0x15e   : > { %v1579_v44 = vadd.f32 %v2583_v59, %v1559_v41  ;;  %1544 = vst.msk [vmem:[#allocation2 + $0x28] sm:$0xff] %vm653_vm4, %v1528_v1  ;;  %v1520_v33 = vld [vmem:[#allocation2 + $0x68] sm:$0xff] }
 0x15f   : > { %v1088_v45 = vpop.f32.mrf.mxu1 }
 0x160   : > { %v1595_v48 = vmax.f32 %v1579_v44, 0.0 }
 0x161   : > { %v1118_v49 = vld [vmem:[#allocation2 + $0x38] sm:$0xff] }
 0x162   : > { %1611 = vst.msk [vmem:[%s2592_s16 + $0x20] sm:$0xff] %vm653_vm4, %v1595_v48  ;;  %v1134_v7 = vadd.f32 %v1118_v49, %v1088_v45 }
 0x163   : > { %v1513_v31 = vld [vmem:[#allocation2 + $0x30] sm:$0xff] }
 0x164   : > { %1150 = vst.msk [vmem:[#allocation2 + $0x38] sm:$0xff] %vm653_vm4, %v1134_v7  ;;  %v1482_v50 = vpop.f32.mrf.mxu2 }
 0x165   : > { %v1560_v51 = vld [vmem:[#allocation2 + $0x28] sm:$0xff]  ;;  %v1106_v54 = vpop.f32.mrf.mxu3  ;;  %v1529_v56 = vadd.f32 %v1513_v31, %v1482_v50 }
 0x166   : > { %v1580_v58 = vadd.f32 %v2583_v59, %v1560_v51  ;;  %v1141_v34 = vadd.f32 %v1125_v57, %v1106_v54 }
 0x167   : > { %1545 = vst.msk [vmem:[#allocation2 + $0x30] sm:$0xff] %vm653_vm4, %v1529_v56  ;;  %v727_v19 = vpop.f32.mrf.mxu0  ;;  %v1091_v12 = vpop.f32.mrf.mxu1 }
 0x168   : > { %v1596_v61 = vmax.f32 %v1580_v58, 0.0  ;;  %1157 = vst.msk [vmem:[#allocation2 + $0x70] sm:$0xff] %vm653_vm4, %v1141_v34 }
 0x169   : > { %755 = vst.msk [vmem:[#allocation2 + $0x40] sm:$0xff] %vm653_vm4, %v727_v19 }
 0x16a   : > { %1612 = vst.msk [vmem:[%s2592_s16 + $0x28] sm:$0xff] %vm653_vm4, %v1596_v61 }
 0x16b   : > { %v1514_v16 = vld [vmem:[#allocation2 + $0x38] sm:$0xff] }
 0x16c   : > { %v1484_v62 = vpop.f32.mrf.mxu2 }
 0x16d   : > { %v1108_v40 = vpop.f32.mrf.mxu3  ;;  %v1530_v9 = vadd.f32 %v1514_v16, %v1484_v62 }
 0x16e   : > { %v1561_v11 = vld [vmem:[#allocation2 + $0x30] sm:$0xff]  ;;  %v1142_v43 = vadd.f32 %v1126_v4, %v1108_v40 }
 0x16f   : > { %v1581_v14 = vadd.f32 %v2583_v59, %v1561_v11  ;;  %1546 = vst.msk [vmem:[#allocation2 + $0x38] sm:$0xff] %vm653_vm4, %v1530_v9  ;;  %v729_v15 = vpop.f32.mrf.mxu0  ;;  %v1093_v55 = vpop.f32.mrf.mxu1  ;;  %v1521_v49 = vld [vmem:[#allocation2 + $0x70] sm:$0xff] }
 0x170   : > { %v1119_v17 = vld [vmem:[#allocation2 + $0x40] sm:$0xff]  ;;  %1158 = vst.msk [vmem:[#allocation2 + $0x78] sm:$0xff] %vm653_vm4, %v1142_v43 }
 0x171   : > { %v1597_v3 = vmax.f32 %v1581_v14, 0.0  ;;  %v1135_v20 = vadd.f32 %v1119_v17, %v1091_v12  ;;  %756 = vst.msk [vmem:[#allocation2 + $0x48] sm:$0xff] %vm653_vm4, %v729_v15 }
 0x173   : > { %1613 = vst.msk [vmem:[%s2592_s16 + $0x30] sm:$0xff] %vm653_vm4, %v1597_v3 }
 0x174   : > { %1151 = vst.msk [vmem:[#allocation2 + $0x40] sm:$0xff] %vm653_vm4, %v1135_v20 }
 0x176   : > { %v1562_v32 = vld [vmem:[#allocation2 + $0x38] sm:$0xff]  ;;  %v1487_v23 = vpop.f32.mrf.mxu2 }
 0x177   : > { %v1582_v18 = vadd.f32 %v2583_v59, %v1562_v32  ;;  %v732_v52 = vpop.f32.mrf.mxu0  ;;  %v1522_v61 = vld [vmem:[#allocation2 + $0x78] sm:$0xff] }
 0x178   : > { %v1120_v21 = vld [vmem:[#allocation2 + $0x48] sm:$0xff]  ;;  %757 = vst.msk [vmem:[#allocation2 + $0x50] sm:$0xff] %vm653_vm4, %v732_v52 }
 0x179   : > { %v1598_v22 = vmax.f32 %v1582_v18, 0.0  ;;  %v1136_v24 = vadd.f32 %v1120_v21, %v1093_v55 }
 0x17b   : > { %1614 = vst.msk [vmem:[%s2592_s16 + $0x38] sm:$0xff] %vm653_vm4, %v1598_v22  ;;  %v1515_v53 = vld [vmem:[#allocation2 + $0x40] sm:$0xff] }
 0x17c   : > { %1152 = vst.msk [vmem:[#allocation2 + $0x48] sm:$0xff] %vm653_vm4, %v1136_v24  ;;  %v1531_v46 = vadd.f32 %v1515_v53, %v1487_v23 }
 0x17d   : > { %v1497_v25 = vpop.f32.mrf.mxu3 }
 0x17e   : > { %1547 = vst.msk [vmem:[#allocation2 + $0x40] sm:$0xff] %vm653_vm4, %v1531_v46  ;;  %v1535_v8 = vadd.f32 %v1519_v26, %v1497_v25  ;;  %v1489_v2 = vpop.f32.mrf.mxu2 }
 0x17f   : > { %v734_v60 = vpop.f32.mrf.mxu0  ;;  %v1121_v0 = vld [vmem:[#allocation2 + $0x50] sm:$0xff] }
 0x180   : > { %1551 = vst.msk [vmem:[#allocation2 + $0x60] sm:$0xff] %vm653_vm4, %v1535_v8  ;;  %v1096_v29 = vpop.f32.mrf.mxu1 }
 0x181   : > { %758 = vst.msk [vmem:[#allocation2 + $0x58] sm:$0xff] %vm653_vm4, %v734_v60  ;;  %v1137_v27 = vadd.f32 %v1121_v0, %v1096_v29 }
 0x183   : > { %v1516_v28 = vld [vmem:[#allocation2 + $0x48] sm:$0xff]  ;;  %1153 = vst.msk [vmem:[#allocation2 + $0x50] sm:$0xff] %vm653_vm4, %v1137_v27 }
 0x184   : > { %v1532_v30 = vadd.f32 %v1516_v28, %v1489_v2 }
 0x185   : > { %v1563_v13 = vld [vmem:[#allocation2 + $0x40] sm:$0xff]  ;;  %v1499_v47 = vpop.f32.mrf.mxu3 }
 0x186   : > { %v1583_v36 = vadd.f32 %v2583_v59, %v1563_v13  ;;  %1548 = vst.msk [vmem:[#allocation2 + $0x48] sm:$0xff] %vm653_vm4, %v1532_v30  ;;  %v1536_v42 = vadd.f32 %v1520_v33, %v1499_v47 }
 0x187   : > { %v1567_v6 = vld [vmem:[#allocation2 + $0x60] sm:$0xff] }
 0x188   : > { %v1599_v63 = vmax.f32 %v1583_v36, 0.0  ;;  %v1587_v37 = vadd.f32 %v2583_v59, %v1567_v6  ;;  %1552 = vst.msk [vmem:[#allocation2 + $0x68] sm:$0xff] %vm653_vm4, %v1536_v42  ;;  %v1098_v35 = vpop.f32.mrf.mxu1  ;;  %v1122_v10 = vld [vmem:[#allocation2 + $0x58] sm:$0xff] }
 0x189   : > { %v1138_v38 = vadd.f32 %v1122_v10, %v1098_v35 }
 0x18a   : > { %1615 = vst.msk [vmem:[%s2592_s16 + $0x40] sm:$0xff] %vm653_vm4, %v1599_v63  ;;  %v1603_v5 = vmax.f32 %v1587_v37, 0.0  ;;  %v1517_v1 = vld [vmem:[#allocation2 + $0x50] sm:$0xff] }
 0x18b   : > { %1154 = vst.msk [vmem:[#allocation2 + $0x58] sm:$0xff] %vm653_vm4, %v1138_v38 }
 0x18c   : > { %1619 = vst.msk [vmem:[%s2592_s16 + $0x60] sm:$0xff] %vm653_vm4, %v1603_v5  ;;  %v1492_v39 = vpop.f32.mrf.mxu2 }
 0x18d   : > { %v1564_v41 = vld [vmem:[#allocation2 + $0x48] sm:$0xff]  ;;  %v1533_v44 = vadd.f32 %v1517_v1, %v1492_v39 }
 0x18e   : > { %v1584_v45 = vadd.f32 %v2583_v59, %v1564_v41  ;;  %v1502_v48 = vpop.f32.mrf.mxu3 }
 0x18f   : > { %v1568_v7 = vld [vmem:[#allocation2 + $0x68] sm:$0xff]  ;;  %1549 = vst.msk [vmem:[#allocation2 + $0x50] sm:$0xff] %vm653_vm4, %v1533_v44  ;;  %v1537_v50 = vadd.f32 %v1521_v49, %v1502_v48 }
 0x190   : > { %v1600_v31 = vmax.f32 %v1584_v45, 0.0  ;;  %v1588_v51 = vadd.f32 %v2583_v59, %v1568_v7 }
 0x191   : > { %1553 = vst.msk [vmem:[#allocation2 + $0x70] sm:$0xff] %vm653_vm4, %v1537_v50 }
 0x192   : > { %1616 = vst.msk [vmem:[%s2592_s16 + $0x48] sm:$0xff] %vm653_vm4, %v1600_v31  ;;  %v1604_v54 = vmax.f32 %v1588_v51, 0.0  ;;  %v1518_v56 = vld [vmem:[#allocation2 + $0x58] sm:$0xff] }
 0x194   : > { %1620 = vst.msk [vmem:[%s2592_s16 + $0x68] sm:$0xff] %vm653_vm4, %v1604_v54  ;;  %v1494_v57 = vpop.f32.mrf.mxu2 }
 0x195   : > { %v1534_v58 = vadd.f32 %v1518_v56, %v1494_v57 }
 0x196   : > { %v1565_v34 = vld [vmem:[#allocation2 + $0x50] sm:$0xff]  ;;  %v1504_v19 = vpop.f32.mrf.mxu3 }
 0x197   : > { %v1585_v62 = vadd.f32 %v2583_v59, %v1565_v34  ;;  %1550 = vst.msk [vmem:[#allocation2 + $0x58] sm:$0xff] %vm653_vm4, %v1534_v58  ;;  %v1538_v16 = vadd.f32 %v1522_v61, %v1504_v19 }
 0x198   : > { %v1569_v40 = vld [vmem:[#allocation2 + $0x70] sm:$0xff] }
 0x199   : > { %v1601_v4 = vmax.f32 %v1585_v62, 0.0  ;;  %v1589_v9 = vadd.f32 %v2583_v59, %v1569_v40  ;;  %1554 = vst.msk [vmem:[#allocation2 + $0x78] sm:$0xff] %vm653_vm4, %v1538_v16 }
 0x19b   : > { %1617 = vst.msk [vmem:[%s2592_s16 + $0x50] sm:$0xff] %vm653_vm4, %v1601_v4  ;;  %v1605_v11 = vmax.f32 %v1589_v9, 0.0 }
 0x19d   : > { %1621 = vst.msk [vmem:[%s2592_s16 + $0x70] sm:$0xff] %vm653_vm4, %v1605_v11 }
 0x19e   : > { %v1566_v12 = vld [vmem:[#allocation2 + $0x58] sm:$0xff] }
 0x19f   : > { %v1586_v43 = vadd.f32 %v2583_v59, %v1566_v12 }
 0x1a0   : > { %v1570_v14 = vld [vmem:[#allocation2 + $0x78] sm:$0xff] }
 0x1a1   : > { %v1602_v15 = vmax.f32 %v1586_v43, 0.0  ;;  %v1590_v17 = vadd.f32 %v2583_v59, %v1570_v14 }
 0x1a3   : > { %1618 = vst.msk [vmem:[%s2592_s16 + $0x58] sm:$0xff] %vm653_vm4, %v1602_v15  ;;  %v1606_v3 = vmax.f32 %v1590_v17, 0.0 }
 0x1a5   : > { %1622 = vst.msk [vmem:[%s2592_s16 + $0x78] sm:$0xff] %vm653_vm4, %v1606_v3 }
 0x1a6 PF: > { %s15_s22 = sadd.s32 1, %s2072_s22   ;;  %s2698_s18 = smov %s2064_s20 }
 0x1a7   : > { %p12_p7 = scmp.ge.s32.totalorder %s15_s22, 6   ;;  %s2699_s19 = smov %s2068_s21 }
 0x1a8   : > { %s2700_s20 = smov %s2703_s23  ;;  %s2701_s21 = smov %s2707_s24 }
 0x1a9   :  { %14 = sbr.rel (!%p12_p7) target bundleno = 3 (0x3), region = 84 }

</bundles_post_ra>
